<compile_context>
chip_gen: v7x
topology: tpu7x:2x2x1
jax: 0.10.0
libtpu: 0.0.40
codegen_flags: <defaults>
</compile_context>

<pallas_src>
import functools

import jax
import jax.numpy as jnp
from jax.experimental import pallas as pl
from jax.experimental.pallas import tpu as pltpu

INPUT_SIZE = 2
HIDDEN_SIZE = 16


# ----------------------- Parameter slab layout ----------------------------- #
def _round_up8(n):
    return -(-n // 8) * 8


def _slab_layout(I, H):
    """Row offsets (8-sublane aligned) of each param inside the packed slab."""
    off = {}
    r = 0
    for name, nrows in (("wih", I), ("whh", H), ("b", 1),
                        ("w1", H), ("b1", 1), ("w2", H), ("b2", 1)):
        off[name] = r
        r += _round_up8(nrows)
    off["_rows"] = r
    return off


def pack_params(raw, I=INPUT_SIZE, H=HIDDEN_SIZE, lanes=128):
    """Pack (wih, whh, b, w1, b1, w2, b2) into one (R, 128) f32 slab."""
    wih, whh, b, w1, b1, w2, b2 = raw
    off = _slab_layout(I, H)
    slab = jnp.zeros((off["_rows"], lanes), jnp.float32)
    for name, a in (("wih", wih), ("whh", whh), ("b", b),
                    ("w1", w1), ("b1", b1), ("w2", w2), ("b2", b2)):
        r, c = a.shape
        slab = slab.at[off[name]:off[name] + r, 0:c].set(a)
    return slab


# ----------------------------- Pallas kernel ------------------------------- #
def _lstm_mlp_kernel(x_ref, p_ref, out_ref, *, I, H, off):
    B, S, _ = x_ref.shape
    G = 4 * H
    out_dim = out_ref.shape[1]

    # Static slices of the packed parameter slab (single DMA'd VMEM block).
    wih = p_ref[off["wih"]:off["wih"] + I, 0:G]        # (I, 4H)
    whh = p_ref[off["whh"]:off["whh"] + H, 0:G]        # (H, 4H)
    b   = p_ref[off["b"]:off["b"] + 1, 0:G]            # (1, 4H)
    w1  = p_ref[off["w1"]:off["w1"] + H, 0:H]          # (H, H)
    b1  = p_ref[off["b1"]:off["b1"] + 1, 0:H]          # (1, H)
    w2  = p_ref[off["w2"]:off["w2"] + H, 0:out_dim]    # (H, out)
    b2  = p_ref[off["b2"]:off["b2"] + 1, 0:out_dim]    # (1, out)

    # Hoisted, h-independent input projections (off the recurrence chain).
    bb = jnp.broadcast_to(b, (B, G))                   # broadcast once
    xwb = [jnp.dot(x_ref[:, t, :], wih,
                   preferred_element_type=jnp.float32) + bb
           for t in range(S)]

    h = jnp.zeros((B, H), jnp.float32)
    c = jnp.zeros((B, H), jnp.float32)

    # Fully unrolled recurrence; only h @ whh sits on the serial chain.
    for t in range(S):
        gates = xwb[t] + jnp.dot(h, whh, preferred_element_type=jnp.float32)
        sig = jax.nn.sigmoid(gates)                    # one lane-dense pass
        tnh = jnp.tanh(gates)
        i_g = sig[:, 0 * H:1 * H]
        f_g = sig[:, 1 * H:2 * H]
        g_g = tnh[:, 2 * H:3 * H]
        o_g = sig[:, 3 * H:4 * H]
        c = f_g * c + i_g * g_g
        h = o_g * jnp.tanh(c)

    # MLP head: Linear -> Tanh -> Linear, fused in the same call.
    z = jnp.tanh(jnp.dot(h, w1, preferred_element_type=jnp.float32) + b1)
    out = jnp.dot(z, w2, preferred_element_type=jnp.float32) + b2
    out_ref[...] = out.astype(out_ref.dtype)


# -------------------------------- Wrapper ----------------------------------- #
def lstm_forward(x, slab, *, hidden_size=HIDDEN_SIZE):
    """x: (batch, seq, input) float32; slab: packed params. Returns (batch, input)."""
    B, S, I = x.shape
    H = hidden_size
    G = 4 * H
    off = _slab_layout(I, H)

    kernel = functools.partial(_lstm_mlp_kernel, I=I, H=H, off=off)
    vmem = pl.BlockSpec(memory_space=pltpu.MemorySpace.VMEM)

    flops = (2 * S * B * I * G          # input projection
             + 2 * S * B * H * G        # recurrence matmuls
             + 8 * S * B * H            # gate elementwise
             + 2 * B * H * H + 2 * B * H * I)
    transcendentals = S * B * (2 * G + H) + B * H
    bytes_accessed = (x.size + slab.size + B * I) * 4

    return pl.pallas_call(
        kernel,
        out_shape=jax.ShapeDtypeStruct((B, I), jnp.float32),
        in_specs=[vmem, vmem],
        out_specs=vmem,
        cost_estimate=pl.CostEstimate(flops=flops,
                                      transcendentals=transcendentals,
                                      bytes_accessed=bytes_accessed),
    )(x, slab)


# ------------------------- Parameter construction --------------------------- #
def init_params(key, input_size=INPUT_SIZE, hidden_size=HIDDEN_SIZE):
    H, I = hidden_size, input_size
    k_lstm = 1.0 / jnp.sqrt(H)
    keys = jax.random.split(key, 8)

    # PyTorch nn.LSTM weights: weight_ih (4H, I), weight_hh (4H, H), biases (4H,)
    # Row blocks are in gate order [i, f, g, o].
    w_ih = jax.random.uniform(keys[0], (4 * H, I), jnp.float32, -k_lstm, k_lstm)
    w_hh = jax.random.uniform(keys[1], (4 * H, H), jnp.float32, -k_lstm, k_lstm)
    b_ih = jax.random.uniform(keys[2], (4 * H,), jnp.float32, -k_lstm, k_lstm)
    b_hh = jax.random.uniform(keys[3], (4 * H,), jnp.float32, -k_lstm, k_lstm)

    # Fused layout: (in, 4H) with gate blocks along lanes; combined bias folded once.
    wih = w_ih.T                                       # (I, 4H)
    whh = w_hh.T                                       # (H, 4H)
    b = (b_ih + b_hh).reshape(1, 4 * H)                # (1, 4H)

    # MLP head: Linear(H, H), Linear(H, I), stored as (in, out).
    k1 = 1.0 / jnp.sqrt(H)
    w1 = jax.random.uniform(keys[4], (H, H), jnp.float32, -k1, k1).T   # (H, H)
    b1 = jax.random.uniform(keys[5], (H,), jnp.float32, -k1, k1).reshape(1, H)
    w2 = jax.random.uniform(keys[6], (I, H), jnp.float32, -k1, k1).T   # (H, I)
    b2 = jax.random.uniform(keys[7], (I,), jnp.float32, -k1, k1).reshape(1, I)

    raw = (wih, whh, b, w1, b1, w2, b2)
    return pack_params(raw, I, H), raw


# --------------------------- Pure-JAX reference ------------------------------ #
def ref_forward(x, raw):
    wih, whh, b, w1, b1, w2, b2 = raw
    xs = jnp.transpose(x, (1, 0, 2))
    B = x.shape[0]
    H = whh.shape[0]
    h = jnp.zeros((B, H), jnp.float32)
    c = jnp.zeros((B, H), jnp.float32)
    for t in range(xs.shape[0]):
        gates = xs[t] @ wih + h @ whh + b
        i = jax.nn.sigmoid(gates[:, 0 * H:1 * H])
        f = jax.nn.sigmoid(gates[:, 1 * H:2 * H])
        g = jnp.tanh(gates[:, 2 * H:3 * H])
        o = jax.nn.sigmoid(gates[:, 3 * H:4 * H])
        c = f * c + i * g
        h = o * jnp.tanh(c)
    z = jnp.tanh(h @ w1 + b1)
    return z @ w2 + b2


if __name__ == "__main__":
    key = jax.random.PRNGKey(0)
    k_x, k_p = jax.random.split(key)

    batch, seq = 8, 8
    x = jax.random.normal(k_x, (batch, seq, INPUT_SIZE), jnp.float32)
    slab, raw = init_params(k_p)

    out = jax.jit(lstm_forward)(x, slab)
    out = jax.block_until_ready(out)

    ref = ref_forward(x, raw)
    assert out.shape == (batch, INPUT_SIZE)
    assert jnp.allclose(out, ref, atol=1e-5, rtol=1e-5), "mismatch vs JAX reference"

    print("KERNEL_OK")
</pallas_src>

<mosaic_0001>
module attributes {stable_mosaic.version = 11 : i64} {
  func.func @_lstm_mlp_kernel(%arg0: memref<8x8x2xf32, #tpu.memory_space<vmem>>, %arg1: memref<80x128xf32, #tpu.memory_space<vmem>>, %arg2: memref<8x2xf32, #tpu.memory_space<vmem>>) attributes {dimension_semantics = [], scalar_prefetch = 0 : i64, scratch_operands = 0 : i64, tpu.core_type = #tpu.core_type<tc>} {
    %c0 = arith.constant 0 : index
    %c0_0 = arith.constant 0 : index
    %0 = vector.load %arg1[%c0, %c0_0] : memref<80x128xf32, #tpu.memory_space<vmem>>, vector<2x64xf32>
    %c8 = arith.constant 8 : index
    %c0_1 = arith.constant 0 : index
    %1 = vector.load %arg1[%c8, %c0_1] : memref<80x128xf32, #tpu.memory_space<vmem>>, vector<16x64xf32>
    %c24 = arith.constant 24 : index
    %c0_2 = arith.constant 0 : index
    %2 = vector.load %arg1[%c24, %c0_2] : memref<80x128xf32, #tpu.memory_space<vmem>>, vector<1x64xf32>
    %c32 = arith.constant 32 : index
    %c0_3 = arith.constant 0 : index
    %3 = vector.load %arg1[%c32, %c0_3] : memref<80x128xf32, #tpu.memory_space<vmem>>, vector<16x16xf32>
    %c48 = arith.constant 48 : index
    %c0_4 = arith.constant 0 : index
    %4 = vector.load %arg1[%c48, %c0_4] : memref<80x128xf32, #tpu.memory_space<vmem>>, vector<1x16xf32>
    %c56 = arith.constant 56 : index
    %c0_5 = arith.constant 0 : index
    %5 = vector.load %arg1[%c56, %c0_5] : memref<80x128xf32, #tpu.memory_space<vmem>>, vector<16x2xf32>
    %c72 = arith.constant 72 : index
    %c0_6 = arith.constant 0 : index
    %6 = vector.load %arg1[%c72, %c0_6] : memref<80x128xf32, #tpu.memory_space<vmem>>, vector<1x2xf32>
    %7 = vector.shape_cast %2 : vector<1x64xf32> to vector<1x64xf32>
    %8 = vector.broadcast %7 : vector<1x64xf32> to vector<8x64xf32>
    %c0_7 = arith.constant 0 : index
    %c0_8 = arith.constant 0 : index
    %c0_9 = arith.constant 0 : index
    %9 = vector.load %arg0[%c0_7, %c0_8, %c0_9] : memref<8x8x2xf32, #tpu.memory_space<vmem>>, vector<8x1x2xf32>
    %10 = vector.shape_cast %9 : vector<8x1x2xf32> to vector<8x2xf32>
    %cst = arith.constant dense<0.000000e+00> : vector<8x64xf32>
    %11 = tpu.matmul %10, %0, %cst {dimension_numbers = #tpu.dot_dimension_numbers<[1], [0], [0], [1], [0, 0, 1, 1], [], []>} : vector<8x2xf32>, vector<2x64xf32>, vector<8x64xf32> -> vector<8x64xf32>
    %12 = arith.addf %11, %8 : vector<8x64xf32>
    %c0_10 = arith.constant 0 : index
    %c1 = arith.constant 1 : index
    %c0_11 = arith.constant 0 : index
    %13 = vector.load %arg0[%c0_10, %c1, %c0_11] : memref<8x8x2xf32, #tpu.memory_space<vmem>>, vector<8x1x2xf32>
    %14 = vector.shape_cast %13 : vector<8x1x2xf32> to vector<8x2xf32>
    %cst_12 = arith.constant dense<0.000000e+00> : vector<8x64xf32>
    %15 = tpu.matmul %14, %0, %cst_12 {dimension_numbers = #tpu.dot_dimension_numbers<[1], [0], [0], [1], [0, 0, 1, 1], [], []>} : vector<8x2xf32>, vector<2x64xf32>, vector<8x64xf32> -> vector<8x64xf32>
    %16 = arith.addf %15, %8 : vector<8x64xf32>
    %c0_13 = arith.constant 0 : index
    %c2 = arith.constant 2 : index
    %c0_14 = arith.constant 0 : index
    %17 = vector.load %arg0[%c0_13, %c2, %c0_14] : memref<8x8x2xf32, #tpu.memory_space<vmem>>, vector<8x1x2xf32>
    %18 = vector.shape_cast %17 : vector<8x1x2xf32> to vector<8x2xf32>
    %cst_15 = arith.constant dense<0.000000e+00> : vector<8x64xf32>
    %19 = tpu.matmul %18, %0, %cst_15 {dimension_numbers = #tpu.dot_dimension_numbers<[1], [0], [0], [1], [0, 0, 1, 1], [], []>} : vector<8x2xf32>, vector<2x64xf32>, vector<8x64xf32> -> vector<8x64xf32>
    %20 = arith.addf %19, %8 : vector<8x64xf32>
    %c0_16 = arith.constant 0 : index
    %c3 = arith.constant 3 : index
    %c0_17 = arith.constant 0 : index
    %21 = vector.load %arg0[%c0_16, %c3, %c0_17] : memref<8x8x2xf32, #tpu.memory_space<vmem>>, vector<8x1x2xf32>
    %22 = vector.shape_cast %21 : vector<8x1x2xf32> to vector<8x2xf32>
    %cst_18 = arith.constant dense<0.000000e+00> : vector<8x64xf32>
    %23 = tpu.matmul %22, %0, %cst_18 {dimension_numbers = #tpu.dot_dimension_numbers<[1], [0], [0], [1], [0, 0, 1, 1], [], []>} : vector<8x2xf32>, vector<2x64xf32>, vector<8x64xf32> -> vector<8x64xf32>
    %24 = arith.addf %23, %8 : vector<8x64xf32>
    %c0_19 = arith.constant 0 : index
    %c4 = arith.constant 4 : index
    %c0_20 = arith.constant 0 : index
    %25 = vector.load %arg0[%c0_19, %c4, %c0_20] : memref<8x8x2xf32, #tpu.memory_space<vmem>>, vector<8x1x2xf32>
    %26 = vector.shape_cast %25 : vector<8x1x2xf32> to vector<8x2xf32>
    %cst_21 = arith.constant dense<0.000000e+00> : vector<8x64xf32>
    %27 = tpu.matmul %26, %0, %cst_21 {dimension_numbers = #tpu.dot_dimension_numbers<[1], [0], [0], [1], [0, 0, 1, 1], [], []>} : vector<8x2xf32>, vector<2x64xf32>, vector<8x64xf32> -> vector<8x64xf32>
    %28 = arith.addf %27, %8 : vector<8x64xf32>
    %c0_22 = arith.constant 0 : index
    %c5 = arith.constant 5 : index
    %c0_23 = arith.constant 0 : index
    %29 = vector.load %arg0[%c0_22, %c5, %c0_23] : memref<8x8x2xf32, #tpu.memory_space<vmem>>, vector<8x1x2xf32>
    %30 = vector.shape_cast %29 : vector<8x1x2xf32> to vector<8x2xf32>
    %cst_24 = arith.constant dense<0.000000e+00> : vector<8x64xf32>
    %31 = tpu.matmul %30, %0, %cst_24 {dimension_numbers = #tpu.dot_dimension_numbers<[1], [0], [0], [1], [0, 0, 1, 1], [], []>} : vector<8x2xf32>, vector<2x64xf32>, vector<8x64xf32> -> vector<8x64xf32>
    %32 = arith.addf %31, %8 : vector<8x64xf32>
    %c0_25 = arith.constant 0 : index
    %c6 = arith.constant 6 : index
    %c0_26 = arith.constant 0 : index
    %33 = vector.load %arg0[%c0_25, %c6, %c0_26] : memref<8x8x2xf32, #tpu.memory_space<vmem>>, vector<8x1x2xf32>
    %34 = vector.shape_cast %33 : vector<8x1x2xf32> to vector<8x2xf32>
    %cst_27 = arith.constant dense<0.000000e+00> : vector<8x64xf32>
    %35 = tpu.matmul %34, %0, %cst_27 {dimension_numbers = #tpu.dot_dimension_numbers<[1], [0], [0], [1], [0, 0, 1, 1], [], []>} : vector<8x2xf32>, vector<2x64xf32>, vector<8x64xf32> -> vector<8x64xf32>
    %36 = arith.addf %35, %8 : vector<8x64xf32>
    %c0_28 = arith.constant 0 : index
    %c7 = arith.constant 7 : index
    %c0_29 = arith.constant 0 : index
    %37 = vector.load %arg0[%c0_28, %c7, %c0_29] : memref<8x8x2xf32, #tpu.memory_space<vmem>>, vector<8x1x2xf32>
    %38 = vector.shape_cast %37 : vector<8x1x2xf32> to vector<8x2xf32>
    %cst_30 = arith.constant dense<0.000000e+00> : vector<8x64xf32>
    %39 = tpu.matmul %38, %0, %cst_30 {dimension_numbers = #tpu.dot_dimension_numbers<[1], [0], [0], [1], [0, 0, 1, 1], [], []>} : vector<8x2xf32>, vector<2x64xf32>, vector<8x64xf32> -> vector<8x64xf32>
    %40 = arith.addf %39, %8 : vector<8x64xf32>
    %cst_31 = arith.constant 0.000000e+00 : f32
    %41 = vector.broadcast %cst_31 : f32 to vector<8x16xf32>
    %cst_32 = arith.constant 0.000000e+00 : f32
    %42 = vector.broadcast %cst_32 : f32 to vector<8x16xf32>
    %cst_33 = arith.constant dense<0.000000e+00> : vector<8x64xf32>
    %43 = tpu.matmul %41, %1, %cst_33 {dimension_numbers = #tpu.dot_dimension_numbers<[1], [0], [0], [1], [0, 0, 1, 1], [], []>} : vector<8x16xf32>, vector<16x64xf32>, vector<8x64xf32> -> vector<8x64xf32>
    %44 = arith.addf %12, %43 : vector<8x64xf32>
    %45 = arith.negf %44 : vector<8x64xf32>
    %46 = math.exp %45 : vector<8x64xf32>
    %cst_34 = arith.constant 1.000000e+00 : f32
    %47 = vector.broadcast %cst_34 : f32 to vector<8x64xf32>
    %48 = arith.addf %47, %46 : vector<8x64xf32>
    %49 = arith.divf %47, %48 : vector<8x64xf32>
    %50 = math.tanh %44 : vector<8x64xf32>
    %51 = vector.extract_strided_slice %49 {offsets = [0, 0], sizes = [8, 16], strides = [1, 1]} : vector<8x64xf32> to vector<8x16xf32>
    %52 = vector.extract_strided_slice %49 {offsets = [0, 16], sizes = [8, 16], strides = [1, 1]} : vector<8x64xf32> to vector<8x16xf32>
    %53 = vector.extract_strided_slice %50 {offsets = [0, 32], sizes = [8, 16], strides = [1, 1]} : vector<8x64xf32> to vector<8x16xf32>
    %54 = vector.extract_strided_slice %49 {offsets = [0, 48], sizes = [8, 16], strides = [1, 1]} : vector<8x64xf32> to vector<8x16xf32>
    %55 = arith.mulf %52, %42 : vector<8x16xf32>
    %56 = arith.mulf %51, %53 : vector<8x16xf32>
    %57 = arith.addf %55, %56 : vector<8x16xf32>
    %58 = math.tanh %57 : vector<8x16xf32>
    %59 = arith.mulf %54, %58 : vector<8x16xf32>
    %cst_35 = arith.constant dense<0.000000e+00> : vector<8x64xf32>
    %60 = tpu.matmul %59, %1, %cst_35 {dimension_numbers = #tpu.dot_dimension_numbers<[1], [0], [0], [1], [0, 0, 1, 1], [], []>} : vector<8x16xf32>, vector<16x64xf32>, vector<8x64xf32> -> vector<8x64xf32>
    %61 = arith.addf %16, %60 : vector<8x64xf32>
    %62 = arith.negf %61 : vector<8x64xf32>
    %63 = math.exp %62 : vector<8x64xf32>
    %cst_36 = arith.constant 1.000000e+00 : f32
    %64 = vector.broadcast %cst_36 : f32 to vector<8x64xf32>
    %65 = arith.addf %64, %63 : vector<8x64xf32>
    %66 = arith.divf %64, %65 : vector<8x64xf32>
    %67 = math.tanh %61 : vector<8x64xf32>
    %68 = vector.extract_strided_slice %66 {offsets = [0, 0], sizes = [8, 16], strides = [1, 1]} : vector<8x64xf32> to vector<8x16xf32>
    %69 = vector.extract_strided_slice %66 {offsets = [0, 16], sizes = [8, 16], strides = [1, 1]} : vector<8x64xf32> to vector<8x16xf32>
    %70 = vector.extract_strided_slice %67 {offsets = [0, 32], sizes = [8, 16], strides = [1, 1]} : vector<8x64xf32> to vector<8x16xf32>
    %71 = vector.extract_strided_slice %66 {offsets = [0, 48], sizes = [8, 16], strides = [1, 1]} : vector<8x64xf32> to vector<8x16xf32>
    %72 = arith.mulf %69, %57 : vector<8x16xf32>
    %73 = arith.mulf %68, %70 : vector<8x16xf32>
    %74 = arith.addf %72, %73 : vector<8x16xf32>
    %75 = math.tanh %74 : vector<8x16xf32>
    %76 = arith.mulf %71, %75 : vector<8x16xf32>
    %cst_37 = arith.constant dense<0.000000e+00> : vector<8x64xf32>
    %77 = tpu.matmul %76, %1, %cst_37 {dimension_numbers = #tpu.dot_dimension_numbers<[1], [0], [0], [1], [0, 0, 1, 1], [], []>} : vector<8x16xf32>, vector<16x64xf32>, vector<8x64xf32> -> vector<8x64xf32>
    %78 = arith.addf %20, %77 : vector<8x64xf32>
    %79 = arith.negf %78 : vector<8x64xf32>
    %80 = math.exp %79 : vector<8x64xf32>
    %cst_38 = arith.constant 1.000000e+00 : f32
    %81 = vector.broadcast %cst_38 : f32 to vector<8x64xf32>
    %82 = arith.addf %81, %80 : vector<8x64xf32>
    %83 = arith.divf %81, %82 : vector<8x64xf32>
    %84 = math.tanh %78 : vector<8x64xf32>
    %85 = vector.extract_strided_slice %83 {offsets = [0, 0], sizes = [8, 16], strides = [1, 1]} : vector<8x64xf32> to vector<8x16xf32>
    %86 = vector.extract_strided_slice %83 {offsets = [0, 16], sizes = [8, 16], strides = [1, 1]} : vector<8x64xf32> to vector<8x16xf32>
    %87 = vector.extract_strided_slice %84 {offsets = [0, 32], sizes = [8, 16], strides = [1, 1]} : vector<8x64xf32> to vector<8x16xf32>
    %88 = vector.extract_strided_slice %83 {offsets = [0, 48], sizes = [8, 16], strides = [1, 1]} : vector<8x64xf32> to vector<8x16xf32>
    %89 = arith.mulf %86, %74 : vector<8x16xf32>
    %90 = arith.mulf %85, %87 : vector<8x16xf32>
    %91 = arith.addf %89, %90 : vector<8x16xf32>
    %92 = math.tanh %91 : vector<8x16xf32>
    %93 = arith.mulf %88, %92 : vector<8x16xf32>
    %cst_39 = arith.constant dense<0.000000e+00> : vector<8x64xf32>
    %94 = tpu.matmul %93, %1, %cst_39 {dimension_numbers = #tpu.dot_dimension_numbers<[1], [0], [0], [1], [0, 0, 1, 1], [], []>} : vector<8x16xf32>, vector<16x64xf32>, vector<8x64xf32> -> vector<8x64xf32>
    %95 = arith.addf %24, %94 : vector<8x64xf32>
    %96 = arith.negf %95 : vector<8x64xf32>
    %97 = math.exp %96 : vector<8x64xf32>
    %cst_40 = arith.constant 1.000000e+00 : f32
    %98 = vector.broadcast %cst_40 : f32 to vector<8x64xf32>
    %99 = arith.addf %98, %97 : vector<8x64xf32>
    %100 = arith.divf %98, %99 : vector<8x64xf32>
    %101 = math.tanh %95 : vector<8x64xf32>
    %102 = vector.extract_strided_slice %100 {offsets = [0, 0], sizes = [8, 16], strides = [1, 1]} : vector<8x64xf32> to vector<8x16xf32>
    %103 = vector.extract_strided_slice %100 {offsets = [0, 16], sizes = [8, 16], strides = [1, 1]} : vector<8x64xf32> to vector<8x16xf32>
    %104 = vector.extract_strided_slice %101 {offsets = [0, 32], sizes = [8, 16], strides = [1, 1]} : vector<8x64xf32> to vector<8x16xf32>
    %105 = vector.extract_strided_slice %100 {offsets = [0, 48], sizes = [8, 16], strides = [1, 1]} : vector<8x64xf32> to vector<8x16xf32>
    %106 = arith.mulf %103, %91 : vector<8x16xf32>
    %107 = arith.mulf %102, %104 : vector<8x16xf32>
    %108 = arith.addf %106, %107 : vector<8x16xf32>
    %109 = math.tanh %108 : vector<8x16xf32>
    %110 = arith.mulf %105, %109 : vector<8x16xf32>
    %cst_41 = arith.constant dense<0.000000e+00> : vector<8x64xf32>
    %111 = tpu.matmul %110, %1, %cst_41 {dimension_numbers = #tpu.dot_dimension_numbers<[1], [0], [0], [1], [0, 0, 1, 1], [], []>} : vector<8x16xf32>, vector<16x64xf32>, vector<8x64xf32> -> vector<8x64xf32>
    %112 = arith.addf %28, %111 : vector<8x64xf32>
    %113 = arith.negf %112 : vector<8x64xf32>
    %114 = math.exp %113 : vector<8x64xf32>
    %cst_42 = arith.constant 1.000000e+00 : f32
    %115 = vector.broadcast %cst_42 : f32 to vector<8x64xf32>
    %116 = arith.addf %115, %114 : vector<8x64xf32>
    %117 = arith.divf %115, %116 : vector<8x64xf32>
    %118 = math.tanh %112 : vector<8x64xf32>
    %119 = vector.extract_strided_slice %117 {offsets = [0, 0], sizes = [8, 16], strides = [1, 1]} : vector<8x64xf32> to vector<8x16xf32>
    %120 = vector.extract_strided_slice %117 {offsets = [0, 16], sizes = [8, 16], strides = [1, 1]} : vector<8x64xf32> to vector<8x16xf32>
    %121 = vector.extract_strided_slice %118 {offsets = [0, 32], sizes = [8, 16], strides = [1, 1]} : vector<8x64xf32> to vector<8x16xf32>
    %122 = vector.extract_strided_slice %117 {offsets = [0, 48], sizes = [8, 16], strides = [1, 1]} : vector<8x64xf32> to vector<8x16xf32>
    %123 = arith.mulf %120, %108 : vector<8x16xf32>
    %124 = arith.mulf %119, %121 : vector<8x16xf32>
    %125 = arith.addf %123, %124 : vector<8x16xf32>
    %126 = math.tanh %125 : vector<8x16xf32>
    %127 = arith.mulf %122, %126 : vector<8x16xf32>
    %cst_43 = arith.constant dense<0.000000e+00> : vector<8x64xf32>
    %128 = tpu.matmul %127, %1, %cst_43 {dimension_numbers = #tpu.dot_dimension_numbers<[1], [0], [0], [1], [0, 0, 1, 1], [], []>} : vector<8x16xf32>, vector<16x64xf32>, vector<8x64xf32> -> vector<8x64xf32>
    %129 = arith.addf %32, %128 : vector<8x64xf32>
    %130 = arith.negf %129 : vector<8x64xf32>
    %131 = math.exp %130 : vector<8x64xf32>
    %cst_44 = arith.constant 1.000000e+00 : f32
    %132 = vector.broadcast %cst_44 : f32 to vector<8x64xf32>
    %133 = arith.addf %132, %131 : vector<8x64xf32>
    %134 = arith.divf %132, %133 : vector<8x64xf32>
    %135 = math.tanh %129 : vector<8x64xf32>
    %136 = vector.extract_strided_slice %134 {offsets = [0, 0], sizes = [8, 16], strides = [1, 1]} : vector<8x64xf32> to vector<8x16xf32>
    %137 = vector.extract_strided_slice %134 {offsets = [0, 16], sizes = [8, 16], strides = [1, 1]} : vector<8x64xf32> to vector<8x16xf32>
    %138 = vector.extract_strided_slice %135 {offsets = [0, 32], sizes = [8, 16], strides = [1, 1]} : vector<8x64xf32> to vector<8x16xf32>
    %139 = vector.extract_strided_slice %134 {offsets = [0, 48], sizes = [8, 16], strides = [1, 1]} : vector<8x64xf32> to vector<8x16xf32>
    %140 = arith.mulf %137, %125 : vector<8x16xf32>
    %141 = arith.mulf %136, %138 : vector<8x16xf32>
    %142 = arith.addf %140, %141 : vector<8x16xf32>
    %143 = math.tanh %142 : vector<8x16xf32>
    %144 = arith.mulf %139, %143 : vector<8x16xf32>
    %cst_45 = arith.constant dense<0.000000e+00> : vector<8x64xf32>
    %145 = tpu.matmul %144, %1, %cst_45 {dimension_numbers = #tpu.dot_dimension_numbers<[1], [0], [0], [1], [0, 0, 1, 1], [], []>} : vector<8x16xf32>, vector<16x64xf32>, vector<8x64xf32> -> vector<8x64xf32>
    %146 = arith.addf %36, %145 : vector<8x64xf32>
    %147 = arith.negf %146 : vector<8x64xf32>
    %148 = math.exp %147 : vector<8x64xf32>
    %cst_46 = arith.constant 1.000000e+00 : f32
    %149 = vector.broadcast %cst_46 : f32 to vector<8x64xf32>
    %150 = arith.addf %149, %148 : vector<8x64xf32>
    %151 = arith.divf %149, %150 : vector<8x64xf32>
    %152 = math.tanh %146 : vector<8x64xf32>
    %153 = vector.extract_strided_slice %151 {offsets = [0, 0], sizes = [8, 16], strides = [1, 1]} : vector<8x64xf32> to vector<8x16xf32>
    %154 = vector.extract_strided_slice %151 {offsets = [0, 16], sizes = [8, 16], strides = [1, 1]} : vector<8x64xf32> to vector<8x16xf32>
    %155 = vector.extract_strided_slice %152 {offsets = [0, 32], sizes = [8, 16], strides = [1, 1]} : vector<8x64xf32> to vector<8x16xf32>
    %156 = vector.extract_strided_slice %151 {offsets = [0, 48], sizes = [8, 16], strides = [1, 1]} : vector<8x64xf32> to vector<8x16xf32>
    %157 = arith.mulf %154, %142 : vector<8x16xf32>
    %158 = arith.mulf %153, %155 : vector<8x16xf32>
    %159 = arith.addf %157, %158 : vector<8x16xf32>
    %160 = math.tanh %159 : vector<8x16xf32>
    %161 = arith.mulf %156, %160 : vector<8x16xf32>
    %cst_47 = arith.constant dense<0.000000e+00> : vector<8x64xf32>
    %162 = tpu.matmul %161, %1, %cst_47 {dimension_numbers = #tpu.dot_dimension_numbers<[1], [0], [0], [1], [0, 0, 1, 1], [], []>} : vector<8x16xf32>, vector<16x64xf32>, vector<8x64xf32> -> vector<8x64xf32>
    %163 = arith.addf %40, %162 : vector<8x64xf32>
    %164 = arith.negf %163 : vector<8x64xf32>
    %165 = math.exp %164 : vector<8x64xf32>
    %cst_48 = arith.constant 1.000000e+00 : f32
    %166 = vector.broadcast %cst_48 : f32 to vector<8x64xf32>
    %167 = arith.addf %166, %165 : vector<8x64xf32>
    %168 = arith.divf %166, %167 : vector<8x64xf32>
    %169 = math.tanh %163 : vector<8x64xf32>
    %170 = vector.extract_strided_slice %168 {offsets = [0, 0], sizes = [8, 16], strides = [1, 1]} : vector<8x64xf32> to vector<8x16xf32>
    %171 = vector.extract_strided_slice %168 {offsets = [0, 16], sizes = [8, 16], strides = [1, 1]} : vector<8x64xf32> to vector<8x16xf32>
    %172 = vector.extract_strided_slice %169 {offsets = [0, 32], sizes = [8, 16], strides = [1, 1]} : vector<8x64xf32> to vector<8x16xf32>
    %173 = vector.extract_strided_slice %168 {offsets = [0, 48], sizes = [8, 16], strides = [1, 1]} : vector<8x64xf32> to vector<8x16xf32>
    %174 = arith.mulf %171, %159 : vector<8x16xf32>
    %175 = arith.mulf %170, %172 : vector<8x16xf32>
    %176 = arith.addf %174, %175 : vector<8x16xf32>
    %177 = math.tanh %176 : vector<8x16xf32>
    %178 = arith.mulf %173, %177 : vector<8x16xf32>
    %cst_49 = arith.constant dense<0.000000e+00> : vector<8x16xf32>
    %179 = tpu.matmul %178, %3, %cst_49 {dimension_numbers = #tpu.dot_dimension_numbers<[1], [0], [0], [1], [0, 0, 1, 1], [], []>} : vector<8x16xf32>, vector<16x16xf32>, vector<8x16xf32> -> vector<8x16xf32>
    %180 = vector.broadcast %4 : vector<1x16xf32> to vector<8x16xf32>
    %181 = arith.addf %179, %180 : vector<8x16xf32>
    %182 = math.tanh %181 : vector<8x16xf32>
    %cst_50 = arith.constant dense<0.000000e+00> : vector<8x2xf32>
    %183 = tpu.matmul %182, %5, %cst_50 {dimension_numbers = #tpu.dot_dimension_numbers<[1], [0], [0], [1], [0, 0, 1, 1], [], []>} : vector<8x16xf32>, vector<16x2xf32>, vector<8x2xf32> -> vector<8x2xf32>
    %184 = vector.broadcast %6 : vector<1x2xf32> to vector<8x2xf32>
    %185 = arith.addf %183, %184 : vector<8x2xf32>
    %c0_51 = arith.constant 0 : index
    %c0_52 = arith.constant 0 : index
    %186 = vector.load %arg2[%c0_51, %c0_52] : memref<8x2xf32, #tpu.memory_space<vmem>>, vector<8x2xf32>
    tpu.vector_store %arg2[%c0_51, %c0_52], %185 {strides = array<i32>} : memref<8x2xf32, #tpu.memory_space<vmem>>, vector<8x2xf32>,
    return
  }
}

</mosaic_0001>

<bundles_post_ra>
// kernel: lstm_forward.1
= control target key start
LH: loop header
LB: loop body
LE: loop exit
PB: predicated region body
PF: predicated region fallthrough
CT: control target
= control target key end

     0   :  { %vm65_vm0 = vcmask 1041408   ;;  %v2133_v0 = vmov 0.0   ;;  %vm2134_vm1 = vmmov 0   ;;  %vm42_vm2 = vcmask 1041409   ;;  %s2136_s25 = smov 96   ;;  %s2137_s26 = smov 16   ;;  %s2588_s1 = inlined_call_operand.vmem [shape: f32[80,128], index: 1, kind: input, shape index: {}]   ;;  %s2589_s0 = inlined_call_operand.vmem [shape: f32[8,8,2], index: 0, kind: input, shape index: {}]   ;;  %s2590_s2 = inlined_call_operand.vmem [shape: f32[8,2], index: 2, kind: output, shape index: {}]  }
   0x1   :  { %1896 = vmatprep.subr.mxu0 %v2133_v0  ;;  %v2159_v1 = vld [vmem:[%s2588_s1] sm:$0x3]  ;;  %1898 = vmatprep.mubr.msk.f32.mxu0 %vm2134_vm1, %v2133_v0  ;;  %v26_v2 = vld [vmem:[%s2589_s0 + $0x8] sm:$0x1]  ;;  %v27_v3 = vld [vmem:[%s2589_s0 + $0x10] sm:$0x1] }
   0x2   :  { %1897 = vmatpush3.msk.msra.mxu0 %vm65_vm0, %v2159_v1  ;;  %v28_v4 = vld [vmem:[%s2589_s0 + $0x18] sm:$0x1]  ;;  %v29_v5 = vld [vmem:[%s2589_s0 + $0x20] sm:$0x1]  ;;  %1901 = vmatprep.subr.mxu1 %v2133_v0  ;;  %v30_v7 = vld [vmem:[%s2589_s0 + $0x28] sm:$0x1] }
   0x3   :  { %1906 = vmatprep.subr.mxu0 %v2133_v0  ;;  %v25_v6 = vld [vmem:[%s2589_s0] sm:$0x1]  ;;  %v31_v8 = vld [vmem:[%s2589_s0 + $0x30] sm:$0x1]  ;;  %1902 = vmatpush3.msk.msra.mxu1 %vm65_vm0, %v2159_v1  ;;  %v32_v9 = vld [vmem:[%s2589_s0 + $0x38] sm:$0x1] }
   0x4   :  { %v41_v10 = vrot.slane %v26_v2, 7  ;;  %v44_v11 = vrot.slane %v27_v3, 6  ;;  %vm45_vm3 = vcmask 1042434   ;;  %v47_v12 = vrot.slane %v28_v4, 5  ;;  %1903 = vmatprep.mubr.msk.f32.mxu1 %vm2134_vm1, %v2133_v0  ;;  %1911 = vmatprep.subr.mxu1 %v2133_v0  ;;  %v241_v17 = vld [vmem:[%s2589_s0 + $0x2] sm:$0x1] }
   0x5   :  { %vm48_vm4 = vcmask 1043459   ;;  %v50_v13 = vrot.slane %v29_v5, 4  ;;  %vm51_vm5 = vcmask 1044484   ;;  %v53_v14 = vrot.slane %v30_v7, 3  ;;  %v242_v18 = vld [vmem:[%s2589_s0 + $0xa] sm:$0x1] }
   0x6   :  { %v43_v15 = vsel %vm42_vm2, %v41_v10, %v25_v6  ;;  %vm54_vm6 = vcmask 1045509   ;;  %v56_v16 = vrot.slane %v31_v8, 2  ;;  %v243_v19 = vld [vmem:[%s2589_s0 + $0x12] sm:$0x1]  ;;  %vm57_vm7 = vcmask 1046534   ;;  %s2138_s21 = smov 32  }
   0x7   :  { %v46_v20 = vsel %vm45_vm3, %v44_v11, %v43_v15  ;;  %v59_v21 = vrot.slane %v32_v9, 1  ;;  %vm60_vm8 = vcmask 1047559   ;;  %v244_v22 = vld [vmem:[%s2589_s0 + $0x1a] sm:$0x1]  ;;  %v245_v24 = vld [vmem:[%s2589_s0 + $0x22] sm:$0x1] }
   0x8   :  { %v49_v23 = vsel %vm48_vm4, %v47_v12, %v46_v20  ;;  %v246_v25 = vld [vmem:[%s2589_s0 + $0x2a] sm:$0x1]  ;;  %v247_v26 = vld [vmem:[%s2589_s0 + $0x32] sm:$0x1]  ;;  %v248_v28 = vld [vmem:[%s2589_s0 + $0x3a] sm:$0x1] }
   0x9   :  { %v52_v27 = vsel %vm51_vm5, %v50_v13, %v49_v23  ;;  %v257_v29 = vrot.slane %v242_v18, 7  ;;  %v259_v30 = vrot.slane %v243_v19, 6  ;;  %v261_v31 = vrot.slane %v244_v22, 5  ;;  %v445_v35 = vld [vmem:[%s2589_s0 + $0x4] sm:$0x1]  ;;  %v13_v22 = vld [vmem:[%s2588_s1 + $0x10] sm:$0xff] }
   0xa   :  { %v55_v32 = vsel %vm54_vm6, %v53_v14, %v52_v27  ;;  %vm62_vm9 = vcmask 15360   ;;  %v263_v33 = vrot.slane %v245_v24, 4  ;;  %v265_v34 = vrot.slane %v246_v25, 3  ;;  %v446_v40 = vld [vmem:[%s2589_s0 + $0xc] sm:$0x1] }
   0xb   :  { %v58_v36 = vsel %vm57_vm7, %v56_v16, %v55_v32  ;;  %v258_v37 = vsel %vm42_vm2, %v257_v29, %v241_v17  ;;  %v267_v38 = vrot.slane %v247_v26, 2  ;;  %v269_v39 = vrot.slane %v248_v28, 1  ;;  %v447_v41 = vld [vmem:[%s2589_s0 + $0x14] sm:$0x1]  ;;  %v448_v44 = vld [vmem:[%s2589_s0 + $0x1c] sm:$0x1] }
   0xc   :  { %v61_v42 = vsel %vm60_vm8, %v59_v21, %v58_v36  ;;  %v260_v43 = vsel %vm45_vm3, %v259_v30, %v258_v37  ;;  %v449_v45 = vld [vmem:[%s2589_s0 + $0x24] sm:$0x1]  ;;  %v450_v46 = vld [vmem:[%s2589_s0 + $0x2c] sm:$0x1]  ;;  %v451_v48 = vld [vmem:[%s2589_s0 + $0x34] sm:$0x1] }
   0xd   :  { %1899 = vmatmul.mubr.msk.f32.vlgmr.msra.gmra.mrb[0].mxu0 %vm62_vm9, %v61_v42  ;;  %v262_v47 = vsel %vm48_vm4, %v261_v31, %v260_v43  ;;  %v452_v49 = vld [vmem:[%s2589_s0 + $0x3c] sm:$0x1]  ;;  %v461_v50 = vrot.slane %v446_v40, 7  ;;  %v463_v51 = vrot.slane %v447_v41, 6  ;;  %v465_v53 = vrot.slane %v448_v44, 5  ;;  %v12_v21 = vld [vmem:[%s2588_s1 + $0x8] sm:$0xff] }
   0xe   :  { %1907 = vmatpush3.msk.msra.mxu0 %vm65_vm0, %v2159_v1  ;;  %1908 = vmatprep.mubr.msk.f32.mxu0 %vm2134_vm1, %v2133_v0  ;;  %v264_v52 = vsel %vm51_vm5, %v263_v33, %v262_v47  ;;  %v467_v54 = vrot.slane %v449_v45, 4  ;;  %v469_v55 = vrot.slane %v450_v46, 3  ;;  %v649_v56 = vld [vmem:[%s2589_s0 + $0x6] sm:$0x1]  ;;  %v471_v59 = vrot.slane %v451_v48, 2 }
   0xf   :  { %1916 = vmatprep.subr.mxu0 %v2133_v0  ;;  %v266_v57 = vsel %vm54_vm6, %v265_v34, %v264_v52  ;;  %v462_v58 = vsel %vm42_vm2, %v461_v50, %v445_v35  ;;  %v473_v60 = vrot.slane %v452_v49, 1  ;;  %v650_v61 = vld [vmem:[%s2589_s0 + $0xe] sm:$0x1]  ;;  %v651_v62 = vld [vmem:[%s2589_s0 + $0x16] sm:$0x1]  ;;  %v2317_v28 = vpack.c.bf16 %v13_v22, %v12_v21 }
  0x10   :  { %v268_v63 = vsel %vm57_vm7, %v267_v38, %v266_v57  ;;  %v464_v2 = vsel %vm45_vm3, %v463_v51, %v462_v58  ;;  %v652_v3 = vld [vmem:[%s2589_s0 + $0x1e] sm:$0x1]  ;;  %v653_v4 = vld [vmem:[%s2589_s0 + $0x26] sm:$0x1]  ;;  %v654_v5 = vld [vmem:[%s2589_s0 + $0x2e] sm:$0x1] }
  0x11   :  { %v270_v6 = vsel %vm60_vm8, %v269_v39, %v268_v63  ;;  %v466_v7 = vsel %vm48_vm4, %v465_v53, %v464_v2  ;;  %v655_v8 = vld [vmem:[%s2589_s0 + $0x36] sm:$0x1]  ;;  %v665_v9 = vrot.slane %v650_v61, 7  ;;  %v667_v10 = vrot.slane %v651_v62, 6  ;;  %v656_v12 = vld [vmem:[%s2589_s0 + $0x3e] sm:$0x1] }
  0x12   :  { %1909 = vmatmul.mubr.msk.f32.vlgmr.msra.gmra.mrb[2].mxu0 %vm62_vm9, %v270_v6  ;;  %v468_v11 = vsel %vm51_vm5, %v467_v54, %v466_v7  ;;  %v669_v13 = vrot.slane %v652_v3, 5  ;;  %v671_v14 = vrot.slane %v653_v4, 4  ;;  %v673_v17 = vrot.slane %v654_v5, 3  ;;  %v2335_v32 = vld [vmem:[%s2588_s1 + $0x18] ss:$0 sm:$0xff] }
  0x13   :  { %1917 = vmatpush3.msk.msra.mxu0 %vm65_vm0, %v2159_v1  ;;  %1918 = vmatprep.mubr.msk.f32.mxu0 %vm2134_vm1, %v2133_v0  ;;  %v470_v15 = vsel %vm54_vm6, %v469_v55, %v468_v11  ;;  %v666_v16 = vsel %vm42_vm2, %v665_v9, %v649_v56  ;;  %v675_v20 = vrot.slane %v655_v8, 2  ;;  %v677_v25 = vrot.slane %v656_v12, 1  ;;  %v139_v46 = vld [vmem:[%s2589_s0 + $0x1] sm:$0x1]  ;;  %v140_v47 = vld [vmem:[%s2589_s0 + $0x9] sm:$0x1] }
  0x14   :  { %1926 = vmatprep.subr.mxu0 %v2133_v0  ;;  %v472_v18 = vsel %vm57_vm7, %v471_v59, %v470_v15  ;;  %v668_v19 = vsel %vm45_vm3, %v667_v10, %v666_v16  ;;  %v2135_v29 = vmov 0.0|0.0   ;;  %v141_v48 = vld [vmem:[%s2589_s0 + $0x11] sm:$0x1]  ;;  %v142_v49 = vld [vmem:[%s2589_s0 + $0x19] sm:$0x1]  ;;  %v155_v54 = vrot.slane %v140_v47, 7 }
  0x15   :  { %v474_v23 = vsel %vm60_vm8, %v473_v60, %v472_v18  ;;  %v670_v24 = vsel %vm48_vm4, %v669_v13, %v668_v19  ;;  %v143_v50 = vld [vmem:[%s2589_s0 + $0x21] sm:$0x1]  ;;  %v144_v51 = vld [vmem:[%s2589_s0 + $0x29] sm:$0x1]  ;;  %v145_v52 = vld [vmem:[%s2589_s0 + $0x31] sm:$0x1] }
  0x16   :  { %1919 = vmatmul.mubr.msk.f32.vlgmr.msra.gmra.mrb[4].mxu0 %vm62_vm9, %v474_v23  ;;  %v672_v26 = vsel %vm51_vm5, %v671_v14, %v670_v24  ;;  %v146_v53 = vld [vmem:[%s2589_s0 + $0x39] sm:$0x1]  ;;  %v157_v55 = vrot.slane %v141_v48, 6  ;;  %v159_v56 = vrot.slane %v142_v49, 5  ;;  %v161_v57 = vrot.slane %v143_v50, 4 }
  0x17   :  { %1927 = vmatpush3.msk.msra.mxu0 %vm65_vm0, %v2159_v1  ;;  %1928 = vmatprep.mubr.msk.f32.mxu0 %vm2134_vm1, %v2133_v0  ;;  %v674_v27 = vsel %vm54_vm6, %v673_v17, %v672_v26  ;;  %v163_v58 = vrot.slane %v144_v51, 3  ;;  %v343_v59 = vld [vmem:[%s2589_s0 + $0x3] sm:$0x1]  ;;  %v156_v60 = vsel %vm42_vm2, %v155_v54, %v139_v46  ;;  %v165_v61 = vrot.slane %v145_v52, 2  ;;  %v344_v63 = vld [vmem:[%s2589_s0 + $0xb] sm:$0x1] }
  0x18   :  { %2006 = vmatprep.subr.bf16.mxu0 %v2135_v29  ;;  %v676_v30 = vsel %vm57_vm7, %v675_v20, %v674_v27  ;;  %v167_v62 = vrot.slane %v146_v53, 1  ;;  %v345_v2 = vld [vmem:[%s2589_s0 + $0x13] sm:$0x1]  ;;  %v158_v3 = vsel %vm45_vm3, %v157_v55, %v156_v60  ;;  %v346_v4 = vld [vmem:[%s2589_s0 + $0x1b] sm:$0x1]  ;;  %v359_v10 = vrot.slane %v344_v63, 7 }
  0x19   :  { %v678_v31 = vsel %vm60_vm8, %v677_v25, %v676_v30  ;;  %v347_v5 = vld [vmem:[%s2589_s0 + $0x23] sm:$0x1]  ;;  %v348_v6 = vld [vmem:[%s2589_s0 + $0x2b] sm:$0x1]  ;;  %v160_v7 = vsel %vm48_vm4, %v159_v56, %v158_v3  ;;  %v349_v8 = vld [vmem:[%s2589_s0 + $0x33] sm:$0x1] }
  0x1a   :  { %1929 = vmatmul.mubr.msk.f32.vlgmr.msra.gmra.mrb[6].mxu0 %vm62_vm9, %v678_v31  ;;  %v350_v9 = vld [vmem:[%s2589_s0 + $0x3b] sm:$0x1]  ;;  %v361_v11 = vrot.slane %v345_v2, 6  ;;  %v162_v12 = vsel %vm51_vm5, %v161_v57, %v160_v7  ;;  %v363_v13 = vrot.slane %v346_v4, 5  ;;  %v365_v14 = vrot.slane %v347_v5, 4 }
  0x1b   :  { %2008 = vmatpush3.bf16.msra.mxu0 %v2317_v28  ;;  %1940 = vmatprep.mubr.msk.f32.mxu0 %vm2134_vm1, %v2133_v0  ;;  %v367_v15 = vrot.slane %v348_v6, 3  ;;  %v547_v16 = vld [vmem:[%s2589_s0 + $0x5] sm:$0x1]  ;;  %v164_v17 = vsel %vm54_vm6, %v163_v58, %v162_v12  ;;  %v360_v18 = vsel %vm42_vm2, %v359_v10, %v343_v59  ;;  %v369_v19 = vrot.slane %v349_v8, 2  ;;  %v548_v21 = vld [vmem:[%s2589_s0 + $0xd] sm:$0x1] }
  0x1c   :  { %2012 = vmatprep.subr.bf16.mxu0 %v2135_v29  ;;  %v371_v20 = vrot.slane %v350_v9, 1  ;;  %v549_v22 = vld [vmem:[%s2589_s0 + $0x15] sm:$0x1]  ;;  %v166_v23 = vsel %vm57_vm7, %v165_v61, %v164_v17  ;;  %v362_v24 = vsel %vm45_vm3, %v361_v11, %v360_v18  ;;  %v550_v25 = vld [vmem:[%s2589_s0 + $0x1d] sm:$0x1]  ;;  %vm853_vm10 = vcmask 130048  }
  0x1d   :  { %v551_v26 = vld [vmem:[%s2589_s0 + $0x25] sm:$0x1]  ;;  %v552_v27 = vld [vmem:[%s2589_s0 + $0x2d] sm:$0x1]  ;;  %v168_v31 = vsel %vm60_vm8, %v167_v62, %v166_v23  ;;  %v752_v49 = vld [vmem:[%s2589_s0 + $0xf] sm:$0x1] }
  0x1e   :  { %1941 = vmatmul.mubr.f32.vlgmr.msra.gmra.mrb[0].mxu0 %v2133_v0  ;;  %1904 = vmatmul.mubr.msk.f32.vlgmr.msra.gmra.mrb[0].mxu1 %vm62_vm9, %v168_v31  ;;  %v753_v50 = vld [vmem:[%s2589_s0 + $0x17] sm:$0x1]  ;;  %v754_v53 = vld [vmem:[%s2589_s0 + $0x1f] sm:$0x1]  ;;  %v755_v54 = vld [vmem:[%s2589_s0 + $0x27] sm:$0x1] }
  0x1f   :  { %2014 = vmatpush3.bf16.msra.mxu0 %v2317_v28  ;;  %1954 = vmatprep.mubr.msk.f32.mxu0 %vm2134_vm1, %v2133_v0  ;;  %v756_v55 = vld [vmem:[%s2589_s0 + $0x2f] sm:$0x1]  ;;  %v757_v58 = vld [vmem:[%s2589_s0 + $0x37] sm:$0x1]  ;;  %v767_v59 = vrot.slane %v752_v49, 7  ;;  %v769_v60 = vrot.slane %v753_v50, 6 }
  0x20   :  { %2018 = vmatprep.subr.bf16.mxu0 %v2135_v29  ;;  %1912 = vmatpush3.msk.msra.mxu1 %vm65_vm0, %v2159_v1  ;;  %v758_v62 = vld [vmem:[%s2589_s0 + $0x3f] sm:$0x1]  ;;  %v771_v63 = vrot.slane %v754_v53, 5  ;;  %v773_v2 = vrot.slane %v755_v54, 4  ;;  %v775_v5 = vrot.slane %v756_v55, 3  ;;  %v777_v8 = vrot.slane %v757_v58, 2 }
  0x21   :  { %1913 = vmatprep.mubr.msk.f32.mxu1 %vm2134_vm1, %v2133_v0  ;;  %1921 = vmatprep.subr.mxu1 %v2133_v0  ;;  %v779_v11 = vrot.slane %v758_v62, 1 }
  0xf1   :  { %v923_v33 = vpop.f32.mrb[0].mxu0 }
  0xf2   :  { %v2036_v34 = vadd.f32 %v2335_v32, %v923_v33  ;;  %v1942_v35 = vpop.f32.mrb[1].mxu0  ;;  %v364_v33 = vsel %vm48_vm4, %v363_v13, %v362_v24 }
  0xf3   :  { %v554_v35 = vld [vmem:[%s2589_s0 + $0x3d] sm:$0x1] }
  0xf4   :  { %2067 = vtanh.f32 %v2036_v34  ;;  %v1831_v37 = vmul.f32 -1.442695, %v2036_v34  ;;  %v553_v34 = vld [vmem:[%s2589_s0 + $0x35] sm:$0x1]  ;;  %v575_v48 = vrot.slane %v554_v35, 1 }
  0xf5   :  { %v573_v47 = vrot.slane %v553_v34, 2 }
  0xf6   :  { %2069 = vpow2.f32 %v1831_v37  ;;  %v565_v37 = vrot.slane %v549_v22, 6 }
  0xfe   :  { %v2068_v36 = vpop.eup %2067 }
  0xff   :  { %937 = vrot.lane.b32.xlu0 %v2068_v36, %s2136_s25  ;;  %v563_v36 = vrot.slane %v548_v21, 7 }
 0x100   :  { %v2070_v38 = vpop.eup %2069 }
 0x101   :  { %v931_v39 = vadd.f32 1.0, %v2070_v38  ;;  %v366_v38 = vsel %vm51_vm5, %v365_v14, %v364_v33  ;;  %v564_v46 = vsel %vm42_vm2, %v563_v36, %v547_v16 }
 0x102   :  { %v566_v52 = vsel %vm45_vm3, %v565_v37, %v564_v46 }
 0x103   :  { %2071 = vrcp.f32 %v931_v39  ;;  %v567_v39 = vrot.slane %v550_v25, 5 }
 0x105   :  { %v568_v57 = vsel %vm48_vm4, %v567_v39, %v566_v52 }
 0x10d   :  { %v2339_v40 = vpop.eup %2071 }
 0x10e   :  { %v935_v43 = vmul.f32 0.0, %v2339_v40 }
 0x171   :  { %v938_v41 = vpop.permute.xlu0 %937 }
 0x172   :  { %v940_v42 = vmul.f32 %v2339_v40, %v938_v41  ;;  %v569_v41 = vrot.slane %v551_v26, 4 }
 0x174   :  { %942 = vrot.lane.b32.xlu0 %v940_v42, %s2137_s26  ;;  %v571_v42 = vrot.slane %v552_v27, 3  ;;  %v570_v61 = vsel %vm51_vm5, %v569_v41, %v568_v57 }
 0x176   :  { %v572_v3 = vsel %vm54_vm6, %v571_v42, %v570_v61 }
 0x177   :  { %v574_v6 = vsel %vm57_vm7, %v573_v47, %v572_v3 }
 0x178   :  { %v576_v9 = vsel %vm60_vm8, %v575_v48, %v574_v6 }
 0x1e6   :  { %v943_v44 = vpop.permute.xlu0 %942 }
 0x1e7   :  { %v2344_v45 = vadd.f32 %v943_v44, %v935_v43  ;;  %v751_v43 = vld [vmem:[%s2589_s0 + $0x7] sm:$0x1]  ;;  %v368_v44 = vsel %vm54_vm6, %v367_v15, %v366_v38  ;;  %s2139_s0 = smov 80  }
 0x1e8   :  { %v370_v51 = vsel %vm57_vm7, %v369_v19, %v368_v44  ;;  %v768_v4 = vsel %vm42_vm2, %v767_v59, %v751_v43 }
 0x1e9   :  { %2073 = vtanh.f32 %v2344_v45  ;;  %v372_v56 = vsel %vm60_vm8, %v371_v20, %v370_v51  ;;  %v770_v7 = vsel %vm45_vm3, %v769_v60, %v768_v4 }
 0x1ea   :  { %1914 = vmatmul.mubr.msk.f32.vlgmr.msra.gmra.mrb[2].mxu1 %vm62_vm9, %v372_v56  ;;  %v772_v10 = vsel %vm48_vm4, %v771_v63, %v770_v7 }
 0x1eb   :  { %1922 = vmatpush3.msk.msra.mxu1 %vm65_vm0, %v2159_v1  ;;  %1923 = vmatprep.mubr.msk.f32.mxu1 %vm2134_vm1, %v2133_v0  ;;  %v774_v12 = vsel %vm51_vm5, %v773_v2, %v772_v10 }
 0x1ec   :  { %1931 = vmatprep.subr.mxu1 %v2133_v0  ;;  %v776_v13 = vsel %vm54_vm6, %v775_v5, %v774_v12 }
 0x1ed   :  { %v778_v14 = vsel %vm57_vm7, %v777_v8, %v776_v13 }
 0x1ee   :  { %1924 = vmatmul.mubr.msk.f32.vlgmr.msra.gmra.mrb[4].mxu1 %vm62_vm9, %v576_v9  ;;  %v780_v15 = vsel %vm60_vm8, %v779_v11, %v778_v14 }
 0x1ef   :  { %1932 = vmatpush3.msk.msra.mxu1 %vm65_vm0, %v2159_v1  ;;  %1933 = vmatprep.mubr.msk.f32.mxu1 %vm2134_vm1, %v2133_v0 }
 0x1f0   :  { %2009 = vmatprep.subr.bf16.mxu1 %v2135_v29 }
 0x1f2   :  { %1934 = vmatmul.mubr.msk.f32.vlgmr.msra.gmra.mrb[6].mxu1 %vm62_vm9, %v780_v15 }
 0x1f3   :  { %v2074_v30 = vpop.eup %2073  ;;  %2011 = vmatpush3.bf16.msra.mxu1 %v2317_v28  ;;  %1947 = vmatprep.mubr.msk.f32.mxu1 %vm2134_vm1, %v2133_v0 }
 0x1f4   :  { %948 = vrot.lane.b32.xlu1 %v2074_v30, %s2138_s21  ;;  %2015 = vmatprep.subr.bf16.mxu1 %v2135_v29 }
 0x266   :  { %v949_v1 = vpop.permute.xlu1 %948 }
 0x267   :  { %v951_v16 = vmul.f32 %v2339_v40, %v949_v1 }
 0x269   :  { %953 = vrot.lane.b32.xlu1 %v951_v16, %s2139_s0 }
 0x2db   :  { %v954_v17 = vpop.permute.xlu1 %953 }
 0x2dc   :  { %1948 = vmatmul.mubr.msk.f32.vlgmr.msra.gmra.mrb[0].mxu1 %vm853_vm10, %v954_v17 }
 0x2dd   :  { %2017 = vmatpush3.bf16.msra.mxu1 %v2317_v28  ;;  %1961 = vmatprep.mubr.msk.f32.mxu1 %vm2134_vm1, %v2133_v0 }
 0x2de   :  { %2021 = vmatprep.subr.bf16.mxu1 %v2135_v29 }
 0x3af   :  { %v1023_v18 = vpop.f32.mrb[0].mxu1 }
 0x3b0   :  { %v2037_v19 = vadd.f32 %v2335_v32, %v1023_v18  ;;  %v1949_v20 = vpop.f32.mrb[1].mxu1 }
 0x3b2   :  { %2075 = vtanh.f32 %v2037_v19  ;;  %v1833_v21 = vmul.f32 -1.442695, %v2037_v19 }
 0x3b4   :  { %2077 = vpow2.f32 %v1833_v21 }
 0x3bc   :  { %v2076_v40 = vpop.eup %2075 }
 0x3bd   :  { %1037 = vrot.lane.b32.xlu0 %v2076_v40, %s2136_s25 }
 0x3be   :  { %v2078_v22 = vpop.eup %2077 }
 0x3bf   :  { %v1031_v23 = vadd.f32 1.0, %v2078_v22 }
 0x3c1   :  { %2079 = vrcp.f32 %v1031_v23 }
 0x3cb   :  { %v2080_v24 = vpop.eup %2079 }
 0x3cc   :  { %v1035_v27 = vmul.f32 %v2080_v24, %v2344_v45 }
 0x42f   :  { %v1038_v25 = vpop.permute.xlu0 %1037 }
 0x430   :  { %v1040_v26 = vmul.f32 %v2080_v24, %v1038_v25 }
 0x432   :  { %1042 = vrot.lane.b32.xlu1 %v1040_v26, %s2137_s26 }
 0x4a4   :  { %v1043_v30 = vpop.permute.xlu1 %1042 }
 0x4a5   :  { %v1045_v31 = vadd.f32 %v1043_v30, %v1035_v27 }
 0x4a7   :  { %2081 = vtanh.f32 %v1045_v31 }
 0x4b1   :  { %v2082_v33 = vpop.eup %2081 }
 0x4b2   :  { %1048 = vrot.lane.b32.xlu0 %v2082_v33, %s2138_s21 }
 0x524   :  { %v1049_v34 = vpop.permute.xlu0 %1048 }
 0x525   :  { %v1051_v35 = vmul.f32 %v2080_v24, %v1049_v34 }
 0x527   :  { %1053 = vrot.lane.b32.xlu1 %v1051_v35, %s2139_s0 }
 0x599   :  { %v1054_v36 = vpop.permute.xlu1 %1053 }
 0x59a   :  { %1955 = vmatmul.mubr.msk.f32.vlgmr.msra.gmra.mrb[2].mxu0 %vm853_vm10, %v1054_v36 }
 0x59b   :  { %2020 = vmatpush3.bf16.msra.mxu0 %v2317_v28  ;;  %1968 = vmatprep.mubr.msk.f32.mxu0 %vm2134_vm1, %v2133_v0 }
 0x59c   :  { %2024 = vmatprep.subr.bf16.mxu0 %v2135_v29 }
 0x66d   :  { %v1123_v45 = vpop.f32.mrb[2].mxu0 }
 0x66e   :  { %v2038_v37 = vadd.f32 %v2335_v32, %v1123_v45  ;;  %v1956_v38 = vpop.f32.mrb[3].mxu0 }
 0x670   :  { %2083 = vtanh.f32 %v2038_v37  ;;  %v1835_v41 = vmul.f32 -1.442695, %v2038_v37 }
 0x672   :  { %2085 = vpow2.f32 %v1835_v41 }
 0x67a   :  { %v2084_v39 = vpop.eup %2083 }
 0x67b   :  { %1137 = vrot.lane.b32.xlu0 %v2084_v39, %s2136_s25 }
 0x67c   :  { %v2086_v42 = vpop.eup %2085 }
 0x67d   :  { %v1131_v43 = vadd.f32 1.0, %v2086_v42 }
 0x67f   :  { %2087 = vrcp.f32 %v1131_v43 }
 0x689   :  { %v2088_v44 = vpop.eup %2087 }
 0x68a   :  { %v1135_v48 = vmul.f32 %v2088_v44, %v1045_v31 }
 0x6ed   :  { %v1138_v46 = vpop.permute.xlu0 %1137 }
 0x6ee   :  { %v1140_v47 = vmul.f32 %v2088_v44, %v1138_v46 }
 0x6f0   :  { %1142 = vrot.lane.b32.xlu1 %v1140_v47, %s2137_s26 }
 0x762   :  { %v1143_v49 = vpop.permute.xlu1 %1142 }
 0x763   :  { %v1145_v50 = vadd.f32 %v1143_v49, %v1135_v48 }
 0x765   :  { %2089 = vtanh.f32 %v1145_v50 }
 0x76f   :  { %v2090_v51 = vpop.eup %2089 }
 0x770   :  { %1148 = vrot.lane.b32.xlu0 %v2090_v51, %s2138_s21 }
 0x7e2   :  { %v1149_v52 = vpop.permute.xlu0 %1148 }
 0x7e3   :  { %v1151_v53 = vmul.f32 %v2088_v44, %v1149_v52 }
 0x7e5   :  { %1153 = vrot.lane.b32.xlu1 %v1151_v53, %s2139_s0 }
 0x857   :  { %v1154_v54 = vpop.permute.xlu1 %1153 }
 0x858   :  { %1962 = vmatmul.mubr.msk.f32.vlgmr.msra.gmra.mrb[2].mxu1 %vm853_vm10, %v1154_v54 }
 0x859   :  { %2023 = vmatpush3.bf16.msra.mxu1 %v2317_v28  ;;  %1975 = vmatprep.mubr.msk.f32.mxu1 %vm2134_vm1, %v2133_v0 }
 0x85a   :  { %2027 = vmatprep.subr.bf16.mxu1 %v2135_v29 }
 0x92b   :  { %v1223_v55 = vpop.f32.mrb[2].mxu1 }
 0x92c   :  { %v2039_v56 = vadd.f32 %v2335_v32, %v1223_v55  ;;  %v1963_v57 = vpop.f32.mrb[3].mxu1 }
 0x92e   :  { %2091 = vtanh.f32 %v2039_v56  ;;  %v1837_v59 = vmul.f32 -1.442695, %v2039_v56 }
 0x930   :  { %2093 = vpow2.f32 %v1837_v59 }
 0x938   :  { %v2092_v58 = vpop.eup %2091 }
 0x939   :  { %1237 = vrot.lane.b32.xlu0 %v2092_v58, %s2136_s25 }
 0x93a   :  { %v2094_v60 = vpop.eup %2093 }
 0x93b   :  { %v1231_v61 = vadd.f32 1.0, %v2094_v60 }
 0x93d   :  { %2095 = vrcp.f32 %v1231_v61 }
 0x947   :  { %v2096_v62 = vpop.eup %2095 }
 0x948   :  { %v1235_v3 = vmul.f32 %v2096_v62, %v1145_v50 }
 0x9ab   :  { %v1238_v63 = vpop.permute.xlu0 %1237 }
 0x9ac   :  { %v1240_v2 = vmul.f32 %v2096_v62, %v1238_v63 }
 0x9ae   :  { %1242 = vrot.lane.b32.xlu1 %v1240_v2, %s2137_s26 }
 0xa20   :  { %v1243_v4 = vpop.permute.xlu1 %1242 }
 0xa21   :  { %v1245_v5 = vadd.f32 %v1243_v4, %v1235_v3 }
 0xa23   :  { %2097 = vtanh.f32 %v1245_v5 }
 0xa2d   :  { %v2098_v6 = vpop.eup %2097 }
 0xa2e   :  { %1248 = vrot.lane.b32.xlu0 %v2098_v6, %s2138_s21 }
 0xaa0   :  { %v1249_v7 = vpop.permute.xlu0 %1248 }
 0xaa1   :  { %v1251_v8 = vmul.f32 %v2096_v62, %v1249_v7 }
 0xaa3   :  { %1253 = vrot.lane.b32.xlu1 %v1251_v8, %s2139_s0 }
 0xb15   :  { %v1254_v9 = vpop.permute.xlu1 %1253 }
 0xb16   :  { %1969 = vmatmul.mubr.msk.f32.vlgmr.msra.gmra.mrb[4].mxu0 %vm853_vm10, %v1254_v9 }
 0xb17   :  { %2026 = vmatpush3.bf16.msra.mxu0 %v2317_v28  ;;  %1982 = vmatprep.mubr.msk.f32.mxu0 %vm2134_vm1, %v2133_v0 }
 0xb18   :  { %2030 = vmatprep.subr.bf16.mxu0 %v2135_v29 }
 0xbe9   :  { %v1323_v10 = vpop.f32.mrb[4].mxu0 }
 0xbea   :  { %v2040_v11 = vadd.f32 %v2335_v32, %v1323_v10  ;;  %v1970_v12 = vpop.f32.mrb[5].mxu0 }
 0xbec   :  { %2099 = vtanh.f32 %v2040_v11  ;;  %v1839_v14 = vmul.f32 -1.442695, %v2040_v11  ;;  %v16_v11 = vld [vmem:[%s2588_s1 + $0x28] sm:$0xff] }
 0xbee   :  { %2101 = vpow2.f32 %v1839_v14 }
 0xbf6   :  { %v2100_v13 = vpop.eup %2099 }
 0xbf7   :  { %1337 = vrot.lane.b32.xlu0 %v2100_v13, %s2136_s25 }
 0xbf8   :  { %v2102_v15 = vpop.eup %2101 }
 0xbf9   :  { %v1331_v1 = vadd.f32 1.0, %v2102_v15 }
 0xbfb   :  { %2103 = vrcp.f32 %v1331_v1 }
 0xc05   :  { %v2104_v16 = vpop.eup %2103 }
 0xc06   :  { %v1335_v19 = vmul.f32 %v2104_v16, %v1245_v5 }
 0xc69   :  { %v1338_v17 = vpop.permute.xlu0 %1337 }
 0xc6a   :  { %v1340_v18 = vmul.f32 %v2104_v16, %v1338_v17  ;;  %v19_v17 = vld [vmem:[%s2588_s1 + $0x40] sm:$0xff] }
 0xc6c   :  { %1342 = vrot.lane.b32.xlu1 %v1340_v18, %s2137_s26 }
 0xcde   :  { %v1343_v20 = vpop.permute.xlu1 %1342 }
 0xcdf   :  { %v1345_v40 = vadd.f32 %v1343_v20, %v1335_v19  ;;  %v1846_v19 = vld [vmem:[%s2588_s1 + $0x30] ss:$0 sm:$0xff] }
 0xce1   :  { %2105 = vtanh.f32 %v1345_v40 }
 0xceb   :  { %v2106_v21 = vpop.eup %2105 }
 0xcec   :  { %1348 = vrot.lane.b32.xlu0 %v2106_v21, %s2138_s21 }
 0xd5e   :  { %v1349_v22 = vpop.permute.xlu0 %1348 }
 0xd5f   :  { %v1351_v23 = vmul.f32 %v2104_v16, %v1349_v22  ;;  %v18_v16 = vld [vmem:[%s2588_s1 + $0x38] sm:$0xff] }
 0xd60   :  { %v2034_v18 = vpack.c.bf16 %v19_v17, %v18_v16 }
 0xd61   :  { %1353 = vrot.lane.b32.xlu1 %v1351_v23, %s2139_s0  ;;  %v1848_v23 = vld [vmem:[%s2588_s1 + $0x48] ss:$0 sm:$0xff] }
 0xdd3   :  { %v1354_v24 = vpop.permute.xlu1 %1353 }
 0xdd4   :  { %1976 = vmatmul.mubr.msk.f32.vlgmr.msra.gmra.mrb[4].mxu1 %vm853_vm10, %v1354_v24 }
 0xdd5   :  { %2029 = vmatpush3.bf16.msra.mxu1 %v2317_v28  ;;  %1989 = vmatprep.mubr.msk.f32.mxu1 %vm2134_vm1, %v2133_v0 }
 0xdd6   :  { %2033 = vmatprep.subr.bf16.mxu1 %v2135_v29 }
 0xea7   :  { %v1423_v25 = vpop.f32.mrb[4].mxu1 }
 0xea8   :  { %v2041_v26 = vadd.f32 %v2335_v32, %v1423_v25  ;;  %v1977_v27 = vpop.f32.mrb[5].mxu1 }
 0xeaa   :  { %2107 = vtanh.f32 %v2041_v26  ;;  %v1841_v31 = vmul.f32 -1.442695, %v2041_v26 }
 0xeac   :  { %2109 = vpow2.f32 %v1841_v31 }
 0xeb4   :  { %v2108_v30 = vpop.eup %2107 }
 0xeb5   :  { %1437 = vrot.lane.b32.xlu0 %v2108_v30, %s2136_s25 }
 0xeb6   :  { %v2110_v33 = vpop.eup %2109 }
 0xeb7   :  { %v1431_v34 = vadd.f32 1.0, %v2110_v33 }
 0xeb9   :  { %2111 = vrcp.f32 %v1431_v34 }
 0xec3   :  { %v2112_v35 = vpop.eup %2111 }
 0xec4   :  { %v1435_v45 = vmul.f32 %v2112_v35, %v1345_v40 }
 0xf27   :  { %v1438_v28 = vpop.permute.xlu0 %1437 }
 0xf28   :  { %v1440_v36 = vmul.f32 %v2112_v35, %v1438_v28 }
 0xf2a   :  { %1442 = vrot.lane.b32.xlu1 %v1440_v36, %s2137_s26 }
 0xf9c   :  { %v1443_v29 = vpop.permute.xlu1 %1442 }
 0xf9d   :  { %v1445_v37 = vadd.f32 %v1443_v29, %v1435_v45 }
 0xf9f   :  { %2113 = vtanh.f32 %v1445_v37 }
 0xfa9   :  { %v2114_v38 = vpop.eup %2113 }
 0xfaa   :  { %1448 = vrot.lane.b32.xlu0 %v2114_v38, %s2138_s21 }
0x101c   :  { %v1449_v39 = vpop.permute.xlu0 %1448 }
0x101d   :  { %v1451_v41 = vmul.f32 %v2112_v35, %v1449_v39 }
0x101f   :  { %1453 = vrot.lane.b32.xlu1 %v1451_v41, %s2139_s0 }
0x1091   :  { %v1454_v42 = vpop.permute.xlu1 %1453 }
0x1092   :  { %1983 = vmatmul.mubr.msk.f32.vlgmr.msra.gmra.mrb[6].mxu0 %vm853_vm10, %v1454_v42 }
0x1093   :  { %1996 = vmatprep.mubr.msk.f32.mxu0 %vm2134_vm1, %v2133_v0 }
0x1165   :  { %v1523_v43 = vpop.f32.mrb[6].mxu0 }
0x1166   :  { %v2042_v44 = vadd.f32 %v2335_v32, %v1523_v43  ;;  %v1984_v46 = vpop.f32.mrb[7].mxu0 }
0x1168   :  { %2115 = vtanh.f32 %v2042_v44  ;;  %v1843_v48 = vmul.f32 -1.442695, %v2042_v44 }
0x116a   :  { %2117 = vpow2.f32 %v1843_v48 }
0x1172   :  { %v2116_v47 = vpop.eup %2115 }
0x1173   :  { %1537 = vrot.lane.b32.xlu0 %v2116_v47, %s2136_s25 }
0x1174   :  { %v2118_v49 = vpop.eup %2117 }
0x1175   :  { %v1531_v50 = vadd.f32 1.0, %v2118_v49 }
0x1177   :  { %2119 = vrcp.f32 %v1531_v50 }
0x1181   :  { %v2120_v51 = vpop.eup %2119 }
0x1182   :  { %v1535_v54 = vmul.f32 %v2120_v51, %v1445_v37 }
0x11e5   :  { %v1538_v52 = vpop.permute.xlu0 %1537 }
0x11e6   :  { %v1540_v53 = vmul.f32 %v2120_v51, %v1538_v52 }
0x11e8   :  { %1542 = vrot.lane.b32.xlu1 %v1540_v53, %s2137_s26 }
0x125a   :  { %v1543_v55 = vpop.permute.xlu1 %1542 }
0x125b   :  { %v1545_v56 = vadd.f32 %v1543_v55, %v1535_v54 }
0x125d   :  { %2121 = vtanh.f32 %v1545_v56 }
0x1267   :  { %v2122_v57 = vpop.eup %2121 }
0x1268   :  { %1548 = vrot.lane.b32.xlu0 %v2122_v57, %s2138_s21 }
0x12da   :  { %v1549_v58 = vpop.permute.xlu0 %1548 }
0x12db   :  { %v1551_v59 = vmul.f32 %v2120_v51, %v1549_v58 }
0x12dd   :  { %1553 = vrot.lane.b32.xlu1 %v1551_v59, %s2139_s0 }
0x134f   :  { %v1554_v60 = vpop.permute.xlu1 %1553 }
0x1350   :  { %1990 = vmatmul.mubr.msk.f32.vlgmr.msra.gmra.mrb[6].mxu1 %vm853_vm10, %v1554_v60 }
0x1351   :  { %2003 = vmatprep.mubr.msk.f32.mxu1 %vm2134_vm1, %v2133_v0  ;;  %2035 = vmatpush3.bf16.msra.mxu1 %v2034_v18 }
0x1423   :  { %v1623_v61 = vpop.f32.mrb[6].mxu1 }
0x1424   :  { %v2043_v62 = vadd.f32 %v2335_v32, %v1623_v61  ;;  %v1991_v63 = vpop.f32.mrb[7].mxu1  ;;  %v15_v32 = vld [vmem:[%s2588_s1 + $0x20] sm:$0xff] }
0x1425   :  { %v2031_v12 = vpack.c.bf16 %v16_v11, %v15_v32 }
0x1426   :  { %2123 = vtanh.f32 %v2043_v62  ;;  %v1845_v3 = vmul.f32 -1.442695, %v2043_v62 }
0x1427   :  { %2032 = vmatpush3.bf16.msra.mxu0 %v2031_v12 }
0x1428   :  { %2125 = vpow2.f32 %v1845_v3 }
0x1430   :  { %v2124_v2 = vpop.eup %2123 }
0x1431   :  { %1637 = vrot.lane.b32.xlu0 %v2124_v2, %s2136_s25 }
0x1432   :  { %v2126_v4 = vpop.eup %2125 }
0x1433   :  { %v1631_v5 = vadd.f32 1.0, %v2126_v4 }
0x1435   :  { %2127 = vrcp.f32 %v1631_v5 }
0x143f   :  { %v2128_v6 = vpop.eup %2127 }
0x1440   :  { %v1635_v9 = vmul.f32 %v2128_v6, %v1545_v56 }
0x14a3   :  { %v1638_v7 = vpop.permute.xlu0 %1637 }
0x14a4   :  { %v1640_v8 = vmul.f32 %v2128_v6, %v1638_v7 }
0x14a6   :  { %1642 = vrot.lane.b32.xlu1 %v1640_v8, %s2137_s26 }
0x1518   :  { %v1643_v0 = vpop.permute.xlu1 %1642 }
0x1519   :  { %v1645_v10 = vadd.f32 %v1643_v0, %v1635_v9 }
0x151b   :  { %2129 = vtanh.f32 %v1645_v10 }
0x1525   :  { %v2130_v13 = vpop.eup %2129 }
0x1526   :  { %1648 = vrot.lane.b32.xlu0 %v2130_v13, %s2138_s21 }
0x1598   :  { %v1649_v14 = vpop.permute.xlu0 %1648 }
0x1599   :  { %v1651_v15 = vmul.f32 %v2128_v6, %v1649_v14 }
0x159b   :  { %1657 = vrot.lane.b32.xlu1 %v1651_v15, %s2139_s0 }
0x160d   :  { %v1658_v1 = vpop.permute.xlu1 %1657 }
0x160e   :  { %1997 = vmatmul.mubr.msk.f32.vlgmr.msra.gmra.mrb[8].mxu0 %vm853_vm10, %v1658_v1 }
0x16e1   :  { %v1727_v20 = vpop.f32.mrb[8].mxu0 }
0x16e2   :  { %v1728_v40 = vadd.f32 %v1846_v19, %v1727_v20  ;;  %v1998_v21 = vpop.f32.mrb[9].mxu0 }
0x16e4   :  { %2131 = vtanh.f32 %v1728_v40 }
0x16ee   :  { %v2132_v22 = vpop.eup %2131 }
0x16ef   :  { %2004 = vmatmul.mubr.msk.f32.vlgmr.msra.gmra.mrb[8].mxu1 %vm853_vm10, %v2132_v22 }
0x17c2   :  { %v1805_v24 = vpop.f32.mrb[8].mxu1 }
0x17c3   :  { %v1806_v25 = vadd.f32 %v1848_v23, %v1805_v24  ;;  %v2005_v26 = vpop.f32.mrb[9].mxu1 }
0x17c5   :  { %1809 = vst.msk [vmem:[%s2590_s2] sm:$0xff] %vm62_vm9, %v1806_v25 }

</bundles_post_ra>
